<compile_context>
chip_gen: v7x
topology: tpu7x:2x2x1
jax: 0.10.0
libtpu: 0.0.40
codegen_flags: <defaults>
</compile_context>

<pallas_src>
import functools

import jax
import jax.numpy as jnp
from jax.experimental import pallas as pl
from jax.experimental.pallas import tpu as pltpu


def _round_up(n, m):
    return ((n + m - 1) // m) * m


# ---------------------------------------------------------------------------
# Fused kernel: whole autoencoder forward, single invocation, no grid.
# ---------------------------------------------------------------------------
def _fused_ae_kernel(x_ref, p_ref, o_ref, *, enc_specs, dec_specs, compute_dtype):
    """o = decoder(encoder(x)).

    p_ref is ONE packed parameter slab in VMEM.  Each layer is described by a
    static tuple (row_off, rows, cols, relu_flag, fuse_residual); its
    augmented matrix [W; b (; W_res)] is sliced with static offsets and
    contracted against [h | 1 (| skip)], so bias adds and residual
    projections ride the same MXU pass as the Linear.
    """
    f32 = jnp.float32
    x = x_ref[...].astype(f32)                      # (B, input_dim)
    ones = jnp.ones((x.shape[0], 1), f32)           # homogeneous column

    def dense(parts, off, rows, cols):
        lhs = jnp.concatenate(parts, axis=1)        # (B, rows), f32
        a = p_ref[off:off + rows, 0:cols]           # (rows, cols), static slice
        return jnp.dot(lhs.astype(compute_dtype), a,
                       preferred_element_type=f32)  # f32 accumulate

    # ---- encoder: Linear (+fused bias / residual), then ReLU where flagged ----
    h = x
    for (off, rows, cols, relu_after, fuse_res) in enc_specs:
        parts = [h, ones] + ([x] if fuse_res else [])
        h = dense(parts, off, rows, cols)
        if relu_after:
            h = jnp.maximum(h, 0.0)
    z = h

    # ---- decoder: ReLU where flagged, then Linear (+fused bias / residual) ----
    h = z
    for (off, rows, cols, relu_before, fuse_res) in dec_specs:
        hin = jnp.maximum(h, 0.0) if relu_before else h
        parts = [hin, ones] + ([z] if fuse_res else [])
        h = dense(parts, off, rows, cols)

    o_ref[...] = h.astype(o_ref.dtype)


# ---------------------------------------------------------------------------
# Autoencoder: parameter packing + single fused-kernel forward
# ---------------------------------------------------------------------------
class AutoencoderPallas:
    def __init__(self, key, input_dim, hidden_dim, latent_dim, hidden_layers,
                 residual_connection=False, param_dtype=jnp.float32):
        assert hidden_layers > 0, "hidden_layers must be greater than 0"
        layer_dims = [[hidden_dim, hidden_dim] for _ in range(hidden_layers)]
        layer_dims[0][0] = input_dim
        layer_dims[-1][1] = latent_dim
        self.layer_dims = layer_dims
        self.latent_dim = latent_dim
        self.param_dtype = param_dtype

        keys = iter(jax.random.split(key, 4 * hidden_layers + 4))

        def init_linear(din, dout, bias=True):
            # mimic torch.nn.Linear default init: U(-1/sqrt(fan_in), 1/sqrt(fan_in))
            k = 1.0 / (din ** 0.5)
            w = jax.random.uniform(next(keys), (din, dout), jnp.float32, -k, k)
            b = (jax.random.uniform(next(keys), (dout,), jnp.float32, -k, k)
                 if bias else None)
            return w, b

        # Encoder: Linear(in,out); ReLU flags mirror the PyTorch Sequential
        # construction exactly (ReLU appended iff output_d != latent_dim).
        self.enc = [init_linear(din, dout) for din, dout in layer_dims]
        self.enc_relu = [dout != latent_dim for din, dout in layer_dims]

        # Decoder: for [a, b] in reversed(layer_dims) -> [ReLU if b != latent]
        # then Linear(b, a).
        dec_dims = [(b, a) for a, b in reversed(layer_dims)]
        self.dec = [init_linear(din, dout) for din, dout in dec_dims]
        self.dec_relu = [din != latent_dim for din, dout in dec_dims]

        if residual_connection:
            self.enc_res, _ = init_linear(input_dim, latent_dim, bias=False)
            self.dec_res, _ = init_linear(latent_dim, input_dim, bias=False)
        else:
            self.enc_res = None
            self.dec_res = None

        self._pack_params()
        self._jit_forward = jax.jit(self._forward_impl)

    # ---- pack every [W; b (; W_res)] into one slab + static slice metadata ----
    def _pack_params(self):
        has_res = self.enc_res is not None

        def augmented(pairs, res_w):
            mats, fuse_flags = [], []
            n = len(pairs)
            for i, (w, b) in enumerate(pairs):
                fuse = has_res and (i == n - 1)
                blocks = [w, b.reshape(1, -1)]
                if fuse:
                    blocks.append(res_w)
                mats.append(jnp.concatenate(blocks, axis=0))
                fuse_flags.append(fuse)
            return mats, fuse_flags

        enc_mats, enc_fuse = augmented(self.enc, self.enc_res)
        dec_mats, dec_fuse = augmented(self.dec, self.dec_res)
        mats = enc_mats + dec_mats

        width = _round_up(max(m.shape[1] for m in mats), 128)   # lane friendly
        offs, off = [], 0
        for m in mats:
            offs.append(off)
            off += _round_up(m.shape[0], 8)                     # sublane aligned
        slab = jnp.zeros((off, width), self.param_dtype)
        for m, o in zip(mats, offs):
            slab = slab.at[o:o + m.shape[0], 0:m.shape[1]].set(
                m.astype(self.param_dtype))
        self.packed = slab

        ne = len(enc_mats)
        self._enc_specs = tuple(
            (offs[i], int(mats[i].shape[0]), int(mats[i].shape[1]),
             bool(self.enc_relu[i]), bool(enc_fuse[i]))
            for i in range(ne))
        self._dec_specs = tuple(
            (offs[ne + j], int(mats[ne + j].shape[0]), int(mats[ne + j].shape[1]),
             bool(self.dec_relu[j]), bool(dec_fuse[j]))
            for j in range(len(dec_mats)))
        self._flops_per_row = 2 * sum(m.shape[0] * m.shape[1] for m in mats)

    # ---- jitted fused forward ----
    def _forward_impl(self, x, packed):
        orig_shape = x.shape
        x2 = x.reshape(x.shape[0], -1)              # == torch x.view(B, -1)
        B, input_dim = x2.shape

        kern = functools.partial(
            _fused_ae_kernel,
            enc_specs=self._enc_specs,
            dec_specs=self._dec_specs,
            compute_dtype=self.param_dtype,
        )
        vmem = pl.BlockSpec(memory_space=pltpu.MemorySpace.VMEM)
        cost = pl.CostEstimate(
            flops=int(B) * int(self._flops_per_row),
            transcendentals=0,
            bytes_accessed=int(packed.size * packed.dtype.itemsize
                               + x2.size * 4 + B * input_dim * 4),
        )
        y2 = pl.pallas_call(
            kern,
            out_shape=jax.ShapeDtypeStruct((B, input_dim), jnp.float32),
            in_specs=[vmem, vmem],
            out_specs=vmem,
            cost_estimate=cost,
        )(x2, packed)
        return y2.reshape(orig_shape)

    def forward(self, x):
        return self._jit_forward(x, self.packed)

    # ---- pure-JAX reference (PyTorch semantics, unpacked f32 weights) ----
    def forward_ref(self, x):
        orig_shape = x.shape
        h0 = x.reshape(x.shape[0], -1)
        h = h0
        for (w, b), relu in zip(self.enc, self.enc_relu):
            h = h @ w + b
            if relu:
                h = jnp.maximum(h, 0.0)
        if self.enc_res is not None:
            h = h0 @ self.enc_res + h
        z = h
        h = z
        for (w, b), relu in zip(self.dec, self.dec_relu):
            if relu:
                h = jnp.maximum(h, 0.0)
            h = h @ w + b
        if self.dec_res is not None:
            h = z @ self.dec_res + h
        return h.reshape(orig_shape)


if __name__ == "__main__":
    key = jax.random.PRNGKey(0)
    k_param, k_x = jax.random.split(key)

    B, C, H, W = 8, 4, 4, 4          # input_dim = C*H*W = 64, B fills sublanes
    input_dim = C * H * W
    hidden_dim = 32
    latent_dim = 16
    hidden_layers = 3

    x = jax.random.normal(k_x, (B, C, H, W), dtype=jnp.float32)

    # f32-packed parameters (exact path).
    model = AutoencoderPallas(k_param, input_dim, hidden_dim, latent_dim,
                              hidden_layers, residual_connection=True)
    out = jax.block_until_ready(model.forward(x))
    ref = model.forward_ref(x)
    assert out.shape == x.shape
    assert jnp.allclose(out, ref, atol=1e-2, rtol=1e-2), "f32 kernel mismatch"

    # bf16-packed parameters (v6e/v7x fast path): same weights (same key),
    # activations cast to bf16 only at the MXU boundary, f32 accumulation.
    model_bf16 = AutoencoderPallas(k_param, input_dim, hidden_dim, latent_dim,
                                   hidden_layers, residual_connection=True,
                                   param_dtype=jnp.bfloat16)
    out_bf16 = jax.block_until_ready(model_bf16.forward(x))
    assert out_bf16.shape == x.shape
    assert jnp.allclose(out_bf16, ref, atol=1e-1, rtol=1e-1), "bf16 kernel mismatch"

    print("KERNEL_OK")
</pallas_src>

<mosaic_0001>
module attributes {stable_mosaic.version = 11 : i64} {
  func.func @_fused_ae_kernel(%arg0: memref<8x64xf32, #tpu.memory_space<vmem>>, %arg1: memref<336x128xf32, #tpu.memory_space<vmem>>, %arg2: memref<8x64xf32, #tpu.memory_space<vmem>>) attributes {dimension_semantics = [], scalar_prefetch = 0 : i64, scratch_operands = 0 : i64, tpu.core_type = #tpu.core_type<tc>} {
    %c0 = arith.constant 0 : index
    %c0_0 = arith.constant 0 : index
    %0 = vector.load %arg0[%c0, %c0_0] : memref<8x64xf32, #tpu.memory_space<vmem>>, vector<8x64xf32>
    %cst = arith.constant 1.000000e+00 : f32
    %1 = vector.broadcast %cst : f32 to vector<8x1xf32>
    %2 = tpu.concatenate %0, %1 in 1 : vector<8x64xf32>, vector<8x1xf32> -> vector<8x65xf32>
    %c0_1 = arith.constant 0 : index
    %c0_2 = arith.constant 0 : index
    %3 = vector.load %arg1[%c0_1, %c0_2] : memref<336x128xf32, #tpu.memory_space<vmem>>, vector<65x32xf32>
    %cst_3 = arith.constant dense<0.000000e+00> : vector<8x32xf32>
    %4 = tpu.matmul %2, %3, %cst_3 {dimension_numbers = #tpu.dot_dimension_numbers<[1], [0], [0], [1], [0, 0, 1, 1], [], []>} : vector<8x65xf32>, vector<65x32xf32>, vector<8x32xf32> -> vector<8x32xf32>
    %cst_4 = arith.constant 0.000000e+00 : f32
    %5 = vector.broadcast %cst_4 : f32 to vector<8x32xf32>
    %6 = arith.maximumf %4, %5 : vector<8x32xf32>
    %7 = tpu.concatenate %6, %1 in 1 : vector<8x32xf32>, vector<8x1xf32> -> vector<8x33xf32>
    %c72 = arith.constant 72 : index
    %c0_5 = arith.constant 0 : index
    %8 = vector.load %arg1[%c72, %c0_5] : memref<336x128xf32, #tpu.memory_space<vmem>>, vector<33x32xf32>
    %cst_6 = arith.constant dense<0.000000e+00> : vector<8x32xf32>
    %9 = tpu.matmul %7, %8, %cst_6 {dimension_numbers = #tpu.dot_dimension_numbers<[1], [0], [0], [1], [0, 0, 1, 1], [], []>} : vector<8x33xf32>, vector<33x32xf32>, vector<8x32xf32> -> vector<8x32xf32>
    %cst_7 = arith.constant 0.000000e+00 : f32
    %10 = vector.broadcast %cst_7 : f32 to vector<8x32xf32>
    %11 = arith.maximumf %9, %10 : vector<8x32xf32>
    %12 = tpu.concatenate %11, %1, %0 in 1 : vector<8x32xf32>, vector<8x1xf32>, vector<8x64xf32> -> vector<8x97xf32>
    %c112 = arith.constant 112 : index
    %c0_8 = arith.constant 0 : index
    %13 = vector.load %arg1[%c112, %c0_8] : memref<336x128xf32, #tpu.memory_space<vmem>>, vector<97x16xf32>
    %cst_9 = arith.constant dense<0.000000e+00> : vector<8x16xf32>
    %14 = tpu.matmul %12, %13, %cst_9 {dimension_numbers = #tpu.dot_dimension_numbers<[1], [0], [0], [1], [0, 0, 1, 1], [], []>} : vector<8x97xf32>, vector<97x16xf32>, vector<8x16xf32> -> vector<8x16xf32>
    %15 = tpu.concatenate %14, %1 in 1 : vector<8x16xf32>, vector<8x1xf32> -> vector<8x17xf32>
    %c216 = arith.constant 216 : index
    %c0_10 = arith.constant 0 : index
    %16 = vector.load %arg1[%c216, %c0_10] : memref<336x128xf32, #tpu.memory_space<vmem>>, vector<17x32xf32>
    %cst_11 = arith.constant dense<0.000000e+00> : vector<8x32xf32>
    %17 = tpu.matmul %15, %16, %cst_11 {dimension_numbers = #tpu.dot_dimension_numbers<[1], [0], [0], [1], [0, 0, 1, 1], [], []>} : vector<8x17xf32>, vector<17x32xf32>, vector<8x32xf32> -> vector<8x32xf32>
    %cst_12 = arith.constant 0.000000e+00 : f32
    %18 = vector.broadcast %cst_12 : f32 to vector<8x32xf32>
    %19 = arith.maximumf %17, %18 : vector<8x32xf32>
    %20 = tpu.concatenate %19, %1 in 1 : vector<8x32xf32>, vector<8x1xf32> -> vector<8x33xf32>
    %c240 = arith.constant 240 : index
    %c0_13 = arith.constant 0 : index
    %21 = vector.load %arg1[%c240, %c0_13] : memref<336x128xf32, #tpu.memory_space<vmem>>, vector<33x32xf32>
    %cst_14 = arith.constant dense<0.000000e+00> : vector<8x32xf32>
    %22 = tpu.matmul %20, %21, %cst_14 {dimension_numbers = #tpu.dot_dimension_numbers<[1], [0], [0], [1], [0, 0, 1, 1], [], []>} : vector<8x33xf32>, vector<33x32xf32>, vector<8x32xf32> -> vector<8x32xf32>
    %cst_15 = arith.constant 0.000000e+00 : f32
    %23 = vector.broadcast %cst_15 : f32 to vector<8x32xf32>
    %24 = arith.maximumf %22, %23 : vector<8x32xf32>
    %25 = tpu.concatenate %24, %1, %14 in 1 : vector<8x32xf32>, vector<8x1xf32>, vector<8x16xf32> -> vector<8x49xf32>
    %c280 = arith.constant 280 : index
    %c0_16 = arith.constant 0 : index
    %26 = vector.load %arg1[%c280, %c0_16] : memref<336x128xf32, #tpu.memory_space<vmem>>, vector<49x64xf32>
    %cst_17 = arith.constant dense<0.000000e+00> : vector<8x64xf32>
    %27 = tpu.matmul %25, %26, %cst_17 {dimension_numbers = #tpu.dot_dimension_numbers<[1], [0], [0], [1], [0, 0, 1, 1], [], []>} : vector<8x49xf32>, vector<49x64xf32>, vector<8x64xf32> -> vector<8x64xf32>
    %c0_18 = arith.constant 0 : index
    %c0_19 = arith.constant 0 : index
    %28 = vector.load %arg2[%c0_18, %c0_19] : memref<8x64xf32, #tpu.memory_space<vmem>>, vector<8x64xf32>
    tpu.vector_store %arg2[%c0_18, %c0_19], %27 {strides = array<i32>} : memref<8x64xf32, #tpu.memory_space<vmem>>, vector<8x64xf32>,
    return
  }
}

</mosaic_0001>

<bundles_post_ra>
// kernel: _forward_impl.1
= control target key start
LH: loop header
LB: loop body
LE: loop exit
PB: predicated region body
PF: predicated region fallthrough
CT: control target
= control target key end

     0   :  { %7 = vsyncpa [#allocation3], 0  ;;  %s806_s9 = smov [#allocation2]   ;;  %s900_s0 = inlined_call_operand.vmem [shape: f32[8,64], index: 0, kind: input, shape index: {}]   ;;  %s901_s1 = inlined_call_operand.hbm [shape: f32[336,128], index: 1, kind: input, shape index: {}]   ;;  %s902_s2 = inlined_call_operand.vmem [shape: f32[8,64], index: 2, kind: output, shape index: {}]  }
   0x1   :  { %s15_s10 = sshll.u32 %s806_s9, 4  ;;  %s782_s13 = scalar_lea.hbm %s901_s1, 5376  ;;  %s16_s10 = int_to_ptr.vmem [resolvable:$true] %s15_s10 }
   0x2   :  { %p783_p0 = scmp.ne.s32.totalorder %s901_s1, %s782_s13  ;;  %p786_p1 = scmp.lt.u32.totalorder %s782_s13, %s901_s1 }
   0x4   :  { %p788_p2 = pnand %p786_p1, %p783_p0 }
   0x6   :  { %791 = shalt.err (!%p788_p2)
}
   0x7   :  { %s792_s18 = scalar_lea.vmem %s16_s10, 5376  ;;  %p797_p4 = scmp.lt.s32.totalorder %s16_s10, %s16_s10 }
   0x8   :  { %p793_p3 = scmp.ne.s32.totalorder %s16_s10, %s792_s18  ;;  %p798_p5 = scmp.lt.s32.totalorder %s792_s18, %s792_s18 }
   0xa   :  { %p799_p6 = por %p798_p5, %p797_p4 }
   0xc   :  { %p800_p7 = pnand %p799_p6, %p793_p3 }
   0xe   :  { %803 = shalt.err (!%p800_p7)
}
   0xf   :  { %s807_s19 = smov 128   ;;  %s808_s20 = smov 8  }
  0x10   :  { %21 = dma.hbm_to_vmem [thread:$0]  %s901_s1, 5376, %s16_s10, [#allocation3], %s807_s19, %s807_s19, %s808_s20  }
  0x11   :  { %804 = dma.done.wait [#allocation3], 5376  }
  0x12   :  { %805 = vsyncadd [#allocation3], 4294961920  ;;  %v809_v0 = vmov 0.0|0.0   ;;  %vm810_vm0 = vmmov 0   ;;  %v811_v1 = vmov 0.0   ;;  %v28_v2 = vld [vmem:[#allocation2] sm:$0xff] }
  0x13   :  { %721 = vmatprep.subr.bf16.mxu0 %v809_v0  ;;  %637 = vmatprep.mubr.msk.f32.mxu0 %vm810_vm0, %v811_v1  ;;  %v29_v3 = vld [vmem:[#allocation2 + $0x8] sm:$0xff]  ;;  %v30_v4 = vld [vmem:[#allocation2 + $0x10] sm:$0xff]  ;;  %v31_v6 = vld [vmem:[#allocation2 + $0x18] sm:$0xff]  ;;  %vm26_vm1 = vcmask 523264   ;;  %vm41_vm2 = vcmask 1040384   ;;  %vm37_vm3 = vcmask 531456  }
  0x14   :  { %733 = vmatprep.subr.bf16.mxu1 %v809_v0  ;;  %650 = vmatprep.mubr.msk.f32.mxu1 %vm810_vm0, %v811_v1  ;;  %v722_v5 = vpack.c.bf16 %v29_v3, %v28_v2  ;;  %v725_v7 = vpack.c.bf16 %v31_v6, %v30_v4  ;;  %v32_v8 = vld [vmem:[#allocation2 + $0x20] sm:$0xff]  ;;  %v118_v9 = vld [vmem:[#allocation2 + $0x48] sm:$0xff]  ;;  %v119_v10 = vld [vmem:[#allocation2 + $0x50] sm:$0xff]  ;;  %vm116_vm4 = vcmask 261120   ;;  %vm123_vm5 = vcmask 269312  }
  0x15   :  { %v33_v11 = vld [vmem:[#allocation2 + $0x28] sm:$0xff]  ;;  %v734_v12 = vpack.c.bf16 %v119_v10, %v118_v9  ;;  %v120_v13 = vld [vmem:[#allocation2 + $0x58] sm:$0xff]  ;;  %v121_v14 = vld [vmem:[#allocation2 + $0x60] sm:$0xff]  ;;  %vm220_vm6 = vcmask 793600   ;;  %vm297_vm7 = vcmask 130048   ;;  %vm302_vm8 = vcmask 138240  }
  0x16   :  { %723 = vmatpush3.bf16.msra.mxu0 %v722_v5  ;;  %v737_v15 = vpack.c.bf16 %v121_v14, %v120_v13  ;;  %v728_v16 = vpack.c.bf16 %v33_v11, %v32_v8  ;;  %v34_v17 = vld [vmem:[#allocation2 + $0x30] sm:$0xff]  ;;  %v35_v18 = vld [vmem:[#allocation2 + $0x38] sm:$0xff]  ;;  %v25_v20 = vld [vmem:[%s900_s0] sm:$0xff]  ;;  %s812_s0 = smov 33   ;;  %vm476_vm9 = vcmask 400384  }
  0x17   :  { %724 = vmatprep.subr.bf16.mxu0 %v809_v0  ;;  %735 = vmatpush3.bf16.msra.mxu1 %v734_v12  ;;  %v731_v19 = vpack.c.bf16 %v35_v18, %v34_v17  ;;  %v36_v21 = vld [vmem:[#allocation2 + $0x40] sm:$0x1]  ;;  %v27_v22 = vsel %vm26_vm1, %v25_v20, 1.0  ;;  %v122_v23 = vld [vmem:[#allocation2 + $0x68] sm:$0x1]  ;;  %v207_v24 = vld [vmem:[#allocation2 + $0x70] sm:$0xff] }
  0x18   :  { %736 = vmatprep.subr.bf16.mxu1 %v809_v0  ;;  %202 = vrot.lane.b32.xlu0 %v25_v20, %s812_s0  ;;  %v208_v25 = vld [vmem:[#allocation2 + $0x78] sm:$0xff]  ;;  %v209_v30 = vld [vmem:[#allocation2 + $0x80] sm:$0xff]  ;;  %v210_v31 = vld [vmem:[#allocation2 + $0x88] sm:$0xff] }
  0x19   :  { %v740_v29 = vpack.c.bf16 %v208_v25, %v207_v24  ;;  %v743_v33 = vpack.c.bf16 %v210_v31, %v209_v30  ;;  %v211_v34 = vld [vmem:[#allocation2 + $0x90] sm:$0xff]  ;;  %v212_v35 = vld [vmem:[#allocation2 + $0x98] sm:$0xff]  ;;  %v213_v37 = vld [vmem:[#allocation2 + $0xa0] sm:$0xff] }
  0x1a   :  { %726 = vmatpush3.bf16.msra.mxu0 %v725_v7  ;;  %v746_v36 = vpack.c.bf16 %v212_v35, %v211_v34  ;;  %v214_v38 = vld [vmem:[#allocation2 + $0xa8] sm:$0xff]  ;;  %v215_v40 = vld [vmem:[#allocation2 + $0xb0] sm:$0xff]  ;;  %v216_v41 = vld [vmem:[#allocation2 + $0xb8] sm:$0xff] }
  0x1b   :  { %727 = vmatprep.subr.bf16.mxu0 %v809_v0  ;;  %738 = vmatpush3.bf16.msra.mxu1 %v737_v15  ;;  %v749_v39 = vpack.c.bf16 %v214_v38, %v213_v37  ;;  %v752_v42 = vpack.c.bf16 %v216_v41, %v215_v40  ;;  %v217_v43 = vld [vmem:[#allocation2 + $0xc0] sm:$0xff]  ;;  %v218_v44 = vld [vmem:[#allocation2 + $0xc8] sm:$0xff]  ;;  %v219_v46 = vld [vmem:[#allocation2 + $0xd0] sm:$0x1] }
  0x1c   :  { %648 = vmatprep.subr.mxu1 %v811_v1  ;;  %v755_v45 = vpack.c.bf16 %v218_v44, %v217_v43  ;;  %v299_v47 = vld [vmem:[#allocation2 + $0xd8] sm:$0xff]  ;;  %v300_v48 = vld [vmem:[#allocation2 + $0xe0] sm:$0xff]  ;;  %v301_v56 = vld [vmem:[#allocation2 + $0xe8] sm:$0x1] }
  0x1d   :  { %v758_v53 = vpack.c.bf16 %v300_v48, %v299_v47  ;;  %v381_v57 = vld [vmem:[#allocation2 + $0xf0] sm:$0xff]  ;;  %v382_v58 = vld [vmem:[#allocation2 + $0xf8] sm:$0xff]  ;;  %v383_v59 = vld [vmem:[#allocation2 + $0x100] sm:$0xff] }
  0x1e   :  { %729 = vmatpush3.bf16.msra.mxu0 %v728_v16  ;;  %v761_v60 = vpack.c.bf16 %v382_v58, %v381_v57  ;;  %v384_v61 = vld [vmem:[#allocation2 + $0x108] sm:$0xff]  ;;  %v385_v4 = vld [vmem:[#allocation2 + $0x110] sm:$0x1]  ;;  %v469_v5 = vld [vmem:[#allocation2 + $0x118] sm:$0xff] }
  0x1f   :  { %730 = vmatprep.subr.bf16.mxu0 %v809_v0  ;;  %649 = vmatpush3.msk.msra.mxu1 %vm41_vm2, %v122_v23  ;;  %v764_v62 = vpack.c.bf16 %v384_v61, %v383_v59  ;;  %v470_v6 = vld [vmem:[#allocation2 + $0x120] sm:$0xff]  ;;  %v471_v11 = vld [vmem:[#allocation2 + $0x128] sm:$0xff]  ;;  %v472_v12 = vld [vmem:[#allocation2 + $0x130] sm:$0xff] }
  0x20   :  { %739 = vmatprep.subr.bf16.mxu1 %v809_v0  ;;  %v767_v10 = vpack.c.bf16 %v470_v6, %v469_v5  ;;  %v770_v14 = vpack.c.bf16 %v472_v12, %v471_v11  ;;  %v473_v15 = vld [vmem:[#allocation2 + $0x138] sm:$0xff]  ;;  %v474_v16 = vld [vmem:[#allocation2 + $0x140] sm:$0xff]  ;;  %v475_v18 = vld [vmem:[#allocation2 + $0x148] sm:$0x1] }
  0x21   :  { %v773_v17 = vpack.c.bf16 %v474_v16, %v473_v15 }
  0x22   :  { %732 = vmatpush3.bf16.msra.mxu0 %v731_v19 }
  0x23   :  { %635 = vmatprep.subr.mxu0 %v811_v1 }
  0x26   :  { %636 = vmatpush3.msk.msra.mxu0 %vm41_vm2, %v36_v21 }
  0x27   :  { %638 = vmatmul.mubr.msk.f32.vlgmr.msra.gmra.mrb[0].mxu0 %vm37_vm3, %v27_v22  ;;  %760 = vmatprep.subr.bf16.mxu0 %v809_v0 }
  0x28   :  { %701 = vmatprep.mubr.msk.f32.mxu0 %vm810_vm0, %v811_v1  ;;  %762 = vmatpush3.bf16.msra.mxu0 %v761_v60 }
  0x29   :  { %763 = vmatprep.subr.bf16.mxu0 %v809_v0 }
  0x2c   :  { %765 = vmatpush3.bf16.msra.mxu0 %v764_v62 }
  0x2d   :  { %699 = vmatprep.subr.mxu0 %v811_v1 }
  0x30   :  { %700 = vmatpush3.msk.msra.mxu0 %vm41_vm2, %v385_v4 }
  0x31   :  { %766 = vmatprep.subr.bf16.mxu0 %v809_v0 }
  0x8a   :  { %v203_v52 = vpop.permute.xlu0 %202 }
  0xfa   :  { %v111_v26 = vpop.f32.mrb[0].mxu0 }
  0xfb   :  { %v115_v27 = vmax.f32 %v111_v26, 0.0  ;;  %v639_v28 = vpop.f32.mrb[1].mxu0 }
  0xfd   :  { %v117_v32 = vsel %vm116_vm4, %v115_v27, 1.0 }
  0xfe   :  { %651 = vmatmul.mubr.msk.f32.vlgmr.msra.gmra.mrb[0].mxu1 %vm123_vm5, %v117_v32 }
  0xff   :  { %741 = vmatpush3.bf16.msra.mxu1 %v740_v29  ;;  %679 = vmatprep.mubr.msk.f32.mxu1 %vm810_vm0, %v811_v1 }
 0x100   :  { %742 = vmatprep.subr.bf16.mxu1 %v809_v0 }
 0x103   :  { %744 = vmatpush3.bf16.msra.mxu1 %v743_v33 }
 0x104   :  { %745 = vmatprep.subr.bf16.mxu1 %v809_v0 }
 0x107   :  { %747 = vmatpush3.bf16.msra.mxu1 %v746_v36 }
 0x108   :  { %748 = vmatprep.subr.bf16.mxu1 %v809_v0 }
 0x10b   :  { %750 = vmatpush3.bf16.msra.mxu1 %v749_v39 }
 0x10c   :  { %751 = vmatprep.subr.bf16.mxu1 %v809_v0 }
 0x10f   :  { %753 = vmatpush3.bf16.msra.mxu1 %v752_v42 }
 0x110   :  { %754 = vmatprep.subr.bf16.mxu1 %v809_v0 }
 0x113   :  { %756 = vmatpush3.bf16.msra.mxu1 %v755_v45 }
 0x114   :  { %677 = vmatprep.subr.mxu1 %v811_v1 }
 0x117   :  { %678 = vmatpush3.msk.msra.mxu1 %vm41_vm2, %v219_v46 }
 0x118   :  { %757 = vmatprep.subr.bf16.mxu1 %v809_v0 }
 0x1d1   :  { %v196_v49 = vpop.f32.mrb[0].mxu1 }
 0x1d2   :  { %v200_v50 = vmax.f32 %v196_v49, 0.0  ;;  %v652_v51 = vpop.f32.mrb[1].mxu1 }
 0x1d4   :  { %v205_v54 = vsel %vm116_vm4, %v200_v50, 1.0 }
 0x1d5   :  { %v206_v55 = vsel %vm123_vm5, %v205_v54, %v203_v52 }
 0x1d6   :  { %680 = vmatmul.mubr.msk.f32.vlgmr.msra.gmra.mrb[2].mxu1 %vm220_vm6, %v206_v55 }
 0x1d7   :  { %759 = vmatpush3.bf16.msra.mxu1 %v758_v53  ;;  %688 = vmatprep.mubr.msk.f32.mxu1 %vm810_vm0, %v811_v1 }
 0x1d8   :  { %686 = vmatprep.subr.mxu1 %v811_v1 }
 0x1db   :  { %687 = vmatpush3.msk.msra.mxu1 %vm41_vm2, %v301_v56 }
 0x2a9   :  { %v293_v63 = vpop.f32.mrb[2].mxu1 }
 0x2aa   :  { %v298_v2 = vsel %vm297_vm7, %v293_v63, 1.0  ;;  %464 = vrot.lane.b32.xlu0 %v293_v63, %s812_s0  ;;  %v681_v3 = vpop.f32.mrb[3].mxu1 }
 0x2ab   :  { %689 = vmatmul.mubr.msk.f32.vlgmr.msra.gmra.mrb[4].mxu1 %vm302_vm8, %v298_v2 }
 0x31c   :  { %v465_v22 = vpop.permute.xlu0 %464 }
 0x37e   :  { %v375_v7 = vpop.f32.mrb[4].mxu1 }
 0x37f   :  { %v379_v8 = vmax.f32 %v375_v7, 0.0  ;;  %v690_v9 = vpop.f32.mrb[5].mxu1 }
 0x381   :  { %v380_v13 = vsel %vm116_vm4, %v379_v8, 1.0 }
 0x382   :  { %702 = vmatmul.mubr.msk.f32.vlgmr.msra.gmra.mrb[2].mxu0 %vm123_vm5, %v380_v13 }
 0x383   :  { %768 = vmatpush3.bf16.msra.mxu0 %v767_v10  ;;  %718 = vmatprep.mubr.msk.f32.mxu0 %vm810_vm0, %v811_v1 }
 0x384   :  { %769 = vmatprep.subr.bf16.mxu0 %v809_v0 }
 0x387   :  { %771 = vmatpush3.bf16.msra.mxu0 %v770_v14 }
 0x388   :  { %772 = vmatprep.subr.bf16.mxu0 %v809_v0 }
 0x38b   :  { %774 = vmatpush3.bf16.msra.mxu0 %v773_v17 }
 0x38c   :  { %716 = vmatprep.subr.mxu0 %v811_v1 }
 0x38f   :  { %717 = vmatpush3.msk.msra.mxu0 %vm41_vm2, %v475_v18 }
 0x455   :  { %v458_v19 = vpop.f32.mrb[2].mxu0 }
 0x456   :  { %v462_v20 = vmax.f32 %v458_v19, 0.0  ;;  %v703_v21 = vpop.f32.mrb[3].mxu0 }
 0x458   :  { %v467_v23 = vsel %vm116_vm4, %v462_v20, 1.0 }
 0x459   :  { %v468_v24 = vsel %vm123_vm5, %v467_v23, %v465_v22 }
 0x45a   :  { %719 = vmatmul.mubr.msk.f32.vlgmr.msra.gmra.mrb[4].mxu0 %vm476_vm9, %v468_v24 }
 0x52d   :  { %v549_v0 = vpop.f32.mrb[4].mxu0 }
 0x52e   :  { %553 = vst.msk [vmem:[%s902_s2] sm:$0xff] %vm26_vm1, %v549_v0  ;;  %v720_v1 = vpop.f32.mrb[5].mxu0 }
 0x52f   :  { %558 = vsyncpa [#allocation3], 1 }

</bundles_post_ra>
